<compile_context>
chip_gen: v7x
topology: tpu7x:2x2x1
jax: 0.10.0
libtpu: 0.0.40
codegen_flags: <defaults>
</compile_context>

<pallas_src>
import functools
import math

import jax
import jax.numpy as jnp
from jax.experimental import pallas as pl
from jax.experimental.pallas import tpu as pltpu


# Explicit per-tile VMEM budget for the double-buffered f32 input + output
# blocks.  12 MiB fits comfortably under v5e's 16 MiB scoped default and
# v7x's 32 MiB scoped default (64 MiB physical), so no vmem_limit_bytes
# override is required on any generation.
_VMEM_TILE_BUDGET_BYTES = 12 * 1024 * 1024
_MAX_TILE_HW = 65536   # hard cap on pixels per grid step (lane dimension)


def _i32(v):
    """Python int -> int32 constant with two's-complement wraparound."""
    return jnp.int32(((int(v) + 0x80000000) % 0x100000000) - 0x80000000)


def _round_up(x, m):
    return (x + m - 1) // m * m


def _logical_shr(x, s):
    """Logical right shift for int32 (arithmetic shift + mask)."""
    return (x >> s) & ((1 << (32 - s)) - 1)


def _fmix32(x):
    """murmur3 32-bit finalizer (interpret-mode fallback PRNG only)."""
    x = x ^ _logical_shr(x, 16)
    x = x * _i32(0x85EBCA6B)
    x = x ^ _logical_shr(x, 13)
    x = x * _i32(0xC2B2AE35)
    x = x ^ _logical_shr(x, 16)
    return x


def _erfinv_central(x):
    """erfinv central-branch polynomial (Giles 2010).

    Valid for w = -log(1-x^2) < 5, i.e. x <= ~0.9966; callers clamp x so the
    tail branch (needed for <0.4% of samples) is never evaluated.
    """
    w = -jnp.log((1.0 - x) * (1.0 + x))          # one EUP log
    wc = w - 2.5
    p = jnp.float32(2.81022636e-08)
    for c in (3.43273939e-07, -3.5233877e-06, -4.39150654e-06, 0.00021858087,
              -0.00125372503, -0.00417768164, 0.246640727, 1.50140941):
        p = jnp.float32(c) + p * wc
    return p * x


def _perturbed_seg_kernel(seed_ref, x_ref, w_ref, b_ref, o_ref, *,
                          pert_ratio, positive, use_hw_prng):
    # seed_ref: SMEM (1,) int32
    # x_ref: (1, Cin, T) | w_ref: (C, Cin) | b_ref: (C, 1) | o_ref: (1, C, T)
    x = x_ref[0]                       # (Cin, T) -- pixels in lanes
    w = w_ref[...]                     # (C, Cin)
    b = b_ref[...]                     # (C, 1), lane-broadcast below

    # 1x1 conv == channel matmul; result is lane-dense (C, T).  With C/Cin
    # tiny the MXU work is essentially free on the vex slot.
    # TODO(synk): confirm via pl.lower_as_mlir that no XLU relayout of w/x is
    # emitted for this (C,Cin)x(Cin,T) shape; none was observed so far.
    logits = jnp.dot(w, x, preferred_element_type=jnp.float32) + b
    C, T = logits.shape

    # Per-grid-step counter => noise is order-independent across the grid,
    # so both grid axes can legally stay "parallel".
    lin = pl.program_id(0) * pl.num_programs(1) + pl.program_id(1)

    if use_hw_prng:
        # Hardware PRNG: removes the ~30 int32 VALU ops/element of the
        # software hash (the saturating slot for this kernel).
        pltpu.prng_seed(seed_ref[0] ^ (lin * _i32(0x9E3779B9)))
        bits = pltpu.prng_random_bits((C, T))
    else:
        # Software counter hash -- interpret-mode / non-TPU fallback only
        # (pltpu.prng_* has no interpreter lowering).  Scalar parts of the
        # counter are hoisted onto the scalar unit.
        row = jax.lax.broadcasted_iota(jnp.int32, (C, T), 0)   # class index
        col = jax.lax.broadcasted_iota(jnp.int32, (C, T), 1)   # pixel-in-tile
        elem = lin * _i32(T * C) + (col * _i32(C) + row)
        h = _fmix32(elem ^ (seed_ref[0] * _i32(0x9E3779B9)))
        bits = _fmix32(h ^ _i32(0x7F4A7C15))

    # 24 uniform bits -> u in [0, 1); clamp so only the central erfinv branch
    # is ever needed (tail branch Horner + sqrt dropped entirely).  This
    # truncates |noise| at ~2.92*pert_ratio for <0.4% of samples.
    u = (bits & 0x00FFFFFF).astype(jnp.float32) * jnp.float32(1.0 / (1 << 24))
    u = jnp.minimum(u, jnp.float32(0.99651))
    half_normal = _erfinv_central(u)   # == |N(0,1)| / sqrt(2)

    # Fold std, sqrt(2) and polarity into a single constant (one VPU mul).
    scale = math.sqrt(2.0) * (pert_ratio if positive else -pert_ratio)
    o_ref[0] = (logits + jnp.float32(scale) * half_normal).astype(o_ref.dtype)


def all_class_perturbator(x_nchw, weight, bias, seed, *,
                          pert_ratio, positive, tile_hw=None,
                          out_dtype=jnp.float32, use_hw_prng=None):
    """x_nchw: (N, Cin, H, W); weight: (C, Cin) 1x1-conv weight; bias: (C,).

    out_dtype=jnp.bfloat16 halves the output HBM stream (useful on v5e's
    lower bandwidth); in-kernel arithmetic stays f32 either way.
    """
    N, Cin, H, W = x_nchw.shape
    C = weight.shape[0]
    HW = H * W

    if use_hw_prng is None:
        # Hardware PRNG on real TPUs; software counter hash elsewhere
        # (interpret-mode tests).
        use_hw_prng = jax.devices()[0].platform == "tpu"

    if tile_hw is None:
        # Largest lane-dense pixel tile that keeps the double-buffered
        # (input + output) f32 blocks inside the explicit VMEM budget.
        per_pixel_bytes = 2 * 4 * (Cin + C)          # 2 buffers * f32 * (in+out)
        cap = _VMEM_TILE_BUDGET_BYTES // per_pixel_bytes
        cap = max(128, min(_MAX_TILE_HW, (cap // 128) * 128))
        tile_hw = min(cap, _round_up(HW, 128))
    assert tile_hw % 128 == 0, tile_hw

    grid_j = -(-HW // tile_hw)                       # ceil div
    hw_pad = grid_j * tile_hw

    x_flat = jnp.reshape(x_nchw, (N, Cin, HW)).astype(jnp.float32)   # free
    if hw_pad != HW:
        # Pad pixels to a multiple of the tile so every output store is a
        # full unmasked lane-dense vst (no masked tail tile, pipelining kept);
        # padded logits are sliced off below.
        x_flat = jnp.pad(x_flat, ((0, 0), (0, 0), (0, hw_pad - HW)))

    w = weight.astype(jnp.float32)                   # (C, Cin)
    b = jnp.reshape(bias, (C, 1)).astype(jnp.float32)
    seed_arr = jnp.asarray([seed], dtype=jnp.int32)

    kernel = functools.partial(_perturbed_seg_kernel,
                               pert_ratio=float(pert_ratio),
                               positive=bool(positive),
                               use_hw_prng=bool(use_hw_prng))

    # TODO(synk): on v7x, verify in the xprof trace that both TensorCores are
    # active; if not, mark the pixel axis pltpu.CORE_PARALLEL (or shard with
    # pl.core_map over pltpu.create_tensorcore_mesh).
    out_flat = pl.pallas_call(
        kernel,
        out_shape=jax.ShapeDtypeStruct((N, C, hw_pad), out_dtype),
        grid_spec=pltpu.PrefetchScalarGridSpec(
            num_scalar_prefetch=1,                   # seed -> SMEM
            grid=(N, grid_j),
            in_specs=[
                pl.BlockSpec((1, Cin, tile_hw), lambda n, j, seed: (n, 0, j)),
                pl.BlockSpec((C, Cin),          lambda n, j, seed: (0, 0)),
                pl.BlockSpec((C, 1),            lambda n, j, seed: (0, 0)),
            ],
            out_specs=pl.BlockSpec((1, C, tile_hw),
                                   lambda n, j, seed: (n, 0, j)),
        ),
        compiler_params=pltpu.CompilerParams(
            # Per-step re-seeded PRNG => grid steps are order independent, so
            # both axes stay parallel.
            dimension_semantics=("parallel", "parallel")),
    )(seed_arr, x_flat, w, b)

    if hw_pad != HW:
        out_flat = out_flat[:, :, :HW]
    return jnp.reshape(out_flat, (N, C, H, W))       # free reshape, stays NCHW


if __name__ == "__main__":
    # Deterministic parameters / inputs (synthetic -- no checkpoint load).
    key = jax.random.PRNGKey(0)
    kx, kw, kb = jax.random.split(key, 3)

    N, Cin, H, W = 2, 4, 16, 16
    n_classes = 8
    pert_ratio = 0.5
    positive = False

    x = jax.random.normal(kx, (N, Cin, H, W), dtype=jnp.float32)
    weight = 0.1 * jax.random.normal(kw, (n_classes, Cin), dtype=jnp.float32)
    bias = 0.01 * jax.random.normal(kb, (n_classes,), dtype=jnp.float32)

    out = all_class_perturbator(x, weight, bias, seed=1234,
                                pert_ratio=pert_ratio, positive=positive)
    out = jax.block_until_ready(out)

    assert out.shape == (N, n_classes, H, W)
    assert out.dtype == jnp.float32

    # Clean logits reference for the 1x1-conv head.
    clean = jnp.einsum("nchw,kc->nkhw", x, weight,
                       precision=jax.lax.Precision.HIGHEST)
    clean = clean + bias[None, :, None, None]
    noise = out - clean

    # Negative polarity => every class logit is perturbed downward.
    assert bool(jnp.all(noise <= 1e-3)), float(jnp.max(noise))
    # Noise magnitude ~ |N(0, 0.5)|: E|noise| ~= 0.40 (loose sanity bound).
    mean_abs = float(jnp.mean(jnp.abs(noise)))
    assert 0.2 < mean_abs < 0.6, mean_abs

    print("KERNEL_OK")
</pallas_src>

<mosaic_0001>
module attributes {stable_mosaic.version = 11 : i64} {
  func.func @_perturbed_seg_kernel(%arg0: i32, %arg1: i32, %arg2: memref<1xi32, #tpu.memory_space<smem>>, %arg3: memref<1x4x256xf32, #tpu.memory_space<vmem>>, %arg4: memref<8x4xf32, #tpu.memory_space<vmem>>, %arg5: memref<8x1xf32, #tpu.memory_space<vmem>>, %arg6: memref<1x8x256xf32, #tpu.memory_space<vmem>>) attributes {dimension_semantics = [#tpu.dimension_semantics<parallel>, #tpu.dimension_semantics<parallel>], iteration_bounds = array<i64: 2, 1>, scalar_prefetch = 1 : i64, scratch_operands = 0 : i64, tpu.core_type = #tpu.core_type<tc>, window_params = [{transform_indices = @transform_0, window_bounds = array<i64: 1, 4, 256>}, {pipeline_mode = #tpu.pipeline_mode<synchronous>, transform_indices = @transform_1, window_bounds = array<i64: 8, 4>}, {pipeline_mode = #tpu.pipeline_mode<synchronous>, transform_indices = @transform_2, window_bounds = array<i64: 8, 1>}, {transform_indices = @transform_3, window_bounds = array<i64: 1, 8, 256>}]} {
    %c0 = arith.constant 0 : index
    %c0_0 = arith.constant 0 : index
    %c0_1 = arith.constant 0 : index
    %0 = vector.load %arg3[%c0, %c0_0, %c0_1] : memref<1x4x256xf32, #tpu.memory_space<vmem>>, vector<1x4x256xf32>
    %1 = vector.shape_cast %0 : vector<1x4x256xf32> to vector<4x256xf32>
    %c0_2 = arith.constant 0 : index
    %c0_3 = arith.constant 0 : index
    %2 = vector.load %arg4[%c0_2, %c0_3] : memref<8x4xf32, #tpu.memory_space<vmem>>, vector<8x4xf32>
    %c0_4 = arith.constant 0 : index
    %c0_5 = arith.constant 0 : index
    %3 = vector.load %arg5[%c0_4, %c0_5] : memref<8x1xf32, #tpu.memory_space<vmem>>, vector<8x1xf32>
    %cst = arith.constant dense<0.000000e+00> : vector<8x256xf32>
    %4 = tpu.matmul %2, %1, %cst {dimension_numbers = #tpu.dot_dimension_numbers<[1], [0], [0], [1], [0, 0, 1, 1], [], []>} : vector<8x4xf32>, vector<4x256xf32>, vector<8x256xf32> -> vector<8x256xf32>
    %5 = vector.broadcast %3 : vector<8x1xf32> to vector<8x256xf32>
    %6 = arith.addf %4, %5 : vector<8x256xf32>
    %c1_i32 = arith.constant 1 : i32
    %7 = arith.muli %arg0, %c1_i32 : i32
    %8 = arith.addi %7, %arg1 : i32
    %9 = tpu.iota {dimensions = array<i32: 0>} : vector<8x256xi32>
    %10 = tpu.iota {dimensions = array<i32: 1>} : vector<8x256xi32>
    %c2048_i32 = arith.constant 2048 : i32
    %11 = arith.muli %8, %c2048_i32 : i32
    %c8_i32 = arith.constant 8 : i32
    %12 = vector.broadcast %c8_i32 : i32 to vector<8x256xi32>
    %13 = arith.muli %10, %12 : vector<8x256xi32>
    %14 = arith.addi %13, %9 : vector<8x256xi32>
    %15 = vector.broadcast %11 : i32 to vector<8x256xi32>
    %16 = arith.addi %15, %14 : vector<8x256xi32>
    %c0_6 = arith.constant 0 : index
    %17 = memref.load %arg2[%c0_6] : memref<1xi32, #tpu.memory_space<smem>>
    %c-1640531527_i32 = arith.constant -1640531527 : i32
    %18 = arith.muli %17, %c-1640531527_i32 : i32
    %19 = vector.broadcast %18 : i32 to vector<8x256xi32>
    %20 = arith.xori %16, %19 : vector<8x256xi32>
    %c16_i32 = arith.constant 16 : i32
    %21 = vector.broadcast %c16_i32 : i32 to vector<8x256xi32>
    %22 = arith.shrsi %20, %21 : vector<8x256xi32>
    %c65535_i32 = arith.constant 65535 : i32
    %23 = vector.broadcast %c65535_i32 : i32 to vector<8x256xi32>
    %24 = arith.andi %22, %23 : vector<8x256xi32>
    %25 = arith.xori %20, %24 : vector<8x256xi32>
    %c-2048144789_i32 = arith.constant -2048144789 : i32
    %26 = vector.broadcast %c-2048144789_i32 : i32 to vector<8x256xi32>
    %27 = arith.muli %25, %26 : vector<8x256xi32>
    %c13_i32 = arith.constant 13 : i32
    %28 = vector.broadcast %c13_i32 : i32 to vector<8x256xi32>
    %29 = arith.shrsi %27, %28 : vector<8x256xi32>
    %c524287_i32 = arith.constant 524287 : i32
    %30 = vector.broadcast %c524287_i32 : i32 to vector<8x256xi32>
    %31 = arith.andi %29, %30 : vector<8x256xi32>
    %32 = arith.xori %27, %31 : vector<8x256xi32>
    %c-1028477387_i32 = arith.constant -1028477387 : i32
    %33 = vector.broadcast %c-1028477387_i32 : i32 to vector<8x256xi32>
    %34 = arith.muli %32, %33 : vector<8x256xi32>
    %c16_i32_7 = arith.constant 16 : i32
    %35 = vector.broadcast %c16_i32_7 : i32 to vector<8x256xi32>
    %36 = arith.shrsi %34, %35 : vector<8x256xi32>
    %c65535_i32_8 = arith.constant 65535 : i32
    %37 = vector.broadcast %c65535_i32_8 : i32 to vector<8x256xi32>
    %38 = arith.andi %36, %37 : vector<8x256xi32>
    %39 = arith.xori %34, %38 : vector<8x256xi32>
    %c2135587861_i32 = arith.constant 2135587861 : i32
    %40 = vector.broadcast %c2135587861_i32 : i32 to vector<8x256xi32>
    %41 = arith.xori %39, %40 : vector<8x256xi32>
    %c16_i32_9 = arith.constant 16 : i32
    %42 = vector.broadcast %c16_i32_9 : i32 to vector<8x256xi32>
    %43 = arith.shrsi %41, %42 : vector<8x256xi32>
    %c65535_i32_10 = arith.constant 65535 : i32
    %44 = vector.broadcast %c65535_i32_10 : i32 to vector<8x256xi32>
    %45 = arith.andi %43, %44 : vector<8x256xi32>
    %46 = arith.xori %41, %45 : vector<8x256xi32>
    %c-2048144789_i32_11 = arith.constant -2048144789 : i32
    %47 = vector.broadcast %c-2048144789_i32_11 : i32 to vector<8x256xi32>
    %48 = arith.muli %46, %47 : vector<8x256xi32>
    %c13_i32_12 = arith.constant 13 : i32
    %49 = vector.broadcast %c13_i32_12 : i32 to vector<8x256xi32>
    %50 = arith.shrsi %48, %49 : vector<8x256xi32>
    %c524287_i32_13 = arith.constant 524287 : i32
    %51 = vector.broadcast %c524287_i32_13 : i32 to vector<8x256xi32>
    %52 = arith.andi %50, %51 : vector<8x256xi32>
    %53 = arith.xori %48, %52 : vector<8x256xi32>
    %c-1028477387_i32_14 = arith.constant -1028477387 : i32
    %54 = vector.broadcast %c-1028477387_i32_14 : i32 to vector<8x256xi32>
    %55 = arith.muli %53, %54 : vector<8x256xi32>
    %c16_i32_15 = arith.constant 16 : i32
    %56 = vector.broadcast %c16_i32_15 : i32 to vector<8x256xi32>
    %57 = arith.shrsi %55, %56 : vector<8x256xi32>
    %c65535_i32_16 = arith.constant 65535 : i32
    %58 = vector.broadcast %c65535_i32_16 : i32 to vector<8x256xi32>
    %59 = arith.andi %57, %58 : vector<8x256xi32>
    %60 = arith.xori %55, %59 : vector<8x256xi32>
    %c16777215_i32 = arith.constant 16777215 : i32
    %61 = vector.broadcast %c16777215_i32 : i32 to vector<8x256xi32>
    %62 = arith.andi %60, %61 : vector<8x256xi32>
    %63 = arith.sitofp %62 : vector<8x256xi32> to vector<8x256xf32>
    %cst_17 = arith.constant 5.96046448E-8 : f32
    %64 = vector.broadcast %cst_17 : f32 to vector<8x256xf32>
    %65 = arith.mulf %63, %64 : vector<8x256xf32>
    %cst_18 = arith.constant 9.965100e-01 : f32
    %66 = vector.broadcast %cst_18 : f32 to vector<8x256xf32>
    %67 = arith.minimumf %65, %66 : vector<8x256xf32>
    %cst_19 = arith.constant 1.000000e+00 : f32
    %68 = vector.broadcast %cst_19 : f32 to vector<8x256xf32>
    %69 = arith.subf %68, %67 : vector<8x256xf32>
    %cst_20 = arith.constant 1.000000e+00 : f32
    %70 = vector.broadcast %cst_20 : f32 to vector<8x256xf32>
    %71 = arith.addf %70, %67 : vector<8x256xf32>
    %72 = arith.mulf %69, %71 : vector<8x256xf32>
    %73 = math.log %72 : vector<8x256xf32>
    %cst_21 = arith.constant 0.000000e+00 : f32
    %74 = vector.broadcast %cst_21 : f32 to vector<8x256xf32>
    %75 = arith.subf %74, %73 : vector<8x256xf32>
    %cst_22 = arith.constant 2.500000e+00 : f32
    %76 = vector.broadcast %cst_22 : f32 to vector<8x256xf32>
    %77 = arith.subf %75, %76 : vector<8x256xf32>
    %cst_23 = arith.constant 2.81022636E-8 : f32
    %78 = vector.broadcast %cst_23 : f32 to vector<8x256xf32>
    %79 = arith.mulf %78, %77 : vector<8x256xf32>
    %cst_24 = arith.constant 3.43273939E-7 : f32
    %80 = vector.broadcast %cst_24 : f32 to vector<8x256xf32>
    %81 = arith.addf %80, %79 : vector<8x256xf32>
    %82 = arith.mulf %81, %77 : vector<8x256xf32>
    %cst_25 = arith.constant -3.5233877E-6 : f32
    %83 = vector.broadcast %cst_25 : f32 to vector<8x256xf32>
    %84 = arith.addf %83, %82 : vector<8x256xf32>
    %85 = arith.mulf %84, %77 : vector<8x256xf32>
    %cst_26 = arith.constant -4.39150654E-6 : f32
    %86 = vector.broadcast %cst_26 : f32 to vector<8x256xf32>
    %87 = arith.addf %86, %85 : vector<8x256xf32>
    %88 = arith.mulf %87, %77 : vector<8x256xf32>
    %cst_27 = arith.constant 2.1858087E-4 : f32
    %89 = vector.broadcast %cst_27 : f32 to vector<8x256xf32>
    %90 = arith.addf %89, %88 : vector<8x256xf32>
    %91 = arith.mulf %90, %77 : vector<8x256xf32>
    %cst_28 = arith.constant -0.00125372503 : f32
    %92 = vector.broadcast %cst_28 : f32 to vector<8x256xf32>
    %93 = arith.addf %92, %91 : vector<8x256xf32>
    %94 = arith.mulf %93, %77 : vector<8x256xf32>
    %cst_29 = arith.constant -0.00417768164 : f32
    %95 = vector.broadcast %cst_29 : f32 to vector<8x256xf32>
    %96 = arith.addf %95, %94 : vector<8x256xf32>
    %97 = arith.mulf %96, %77 : vector<8x256xf32>
    %cst_30 = arith.constant 0.246640727 : f32
    %98 = vector.broadcast %cst_30 : f32 to vector<8x256xf32>
    %99 = arith.addf %98, %97 : vector<8x256xf32>
    %100 = arith.mulf %99, %77 : vector<8x256xf32>
    %cst_31 = arith.constant 1.50140941 : f32
    %101 = vector.broadcast %cst_31 : f32 to vector<8x256xf32>
    %102 = arith.addf %101, %100 : vector<8x256xf32>
    %103 = arith.mulf %102, %67 : vector<8x256xf32>
    %cst_32 = arith.constant -0.707106769 : f32
    %104 = vector.broadcast %cst_32 : f32 to vector<8x256xf32>
    %105 = arith.mulf %104, %103 : vector<8x256xf32>
    %106 = arith.addf %6, %105 : vector<8x256xf32>
    %c0_33 = arith.constant 0 : index
    %c0_34 = arith.constant 0 : index
    %c0_35 = arith.constant 0 : index
    %107 = vector.load %arg6[%c0_33, %c0_34, %c0_35] : memref<1x8x256xf32, #tpu.memory_space<vmem>>, vector<1x8x256xf32>
    %108 = vector.shape_cast %107 : vector<1x8x256xf32> to vector<8x256xf32>
    %109 = vector.shape_cast %106 : vector<8x256xf32> to vector<1x8x256xf32>
    tpu.vector_store %arg6[%c0_33, %c0_34, %c0_35], %109 {strides = array<i32>} : memref<1x8x256xf32, #tpu.memory_space<vmem>>, vector<1x8x256xf32>,
    return
  }
  func.func @transform_0(%arg0: i32, %arg1: i32, %arg2: memref<1xi32, #tpu.memory_space<smem>>) -> (i32, i32, i32) {
    %c0_i32 = arith.constant 0 : i32
    %c0_i32_0 = arith.constant 0 : i32
    return %arg0, %c0_i32, %arg1 : i32, i32, i32
  }
  func.func @transform_1(%arg0: i32, %arg1: i32, %arg2: memref<1xi32, #tpu.memory_space<smem>>) -> (i32, i32) {
    %c0_i32 = arith.constant 0 : i32
    %c0_i32_0 = arith.constant 0 : i32
    %c0_i32_1 = arith.constant 0 : i32
    return %c0_i32, %c0_i32_0 : i32, i32
  }
  func.func @transform_2(%arg0: i32, %arg1: i32, %arg2: memref<1xi32, #tpu.memory_space<smem>>) -> (i32, i32) {
    %c0_i32 = arith.constant 0 : i32
    %c0_i32_0 = arith.constant 0 : i32
    %c0_i32_1 = arith.constant 0 : i32
    return %c0_i32, %c0_i32_0 : i32, i32
  }
  func.func @transform_3(%arg0: i32, %arg1: i32, %arg2: memref<1xi32, #tpu.memory_space<smem>>) -> (i32, i32, i32) {
    %c0_i32 = arith.constant 0 : i32
    %c0_i32_0 = arith.constant 0 : i32
    return %arg0, %c0_i32, %arg1 : i32, i32, i32
  }
}

</mosaic_0001>

<bundles_post_ra>
// kernel: tpu_custom_call.1
= control target key start
LH: loop header
LB: loop body
LE: loop exit
PB: predicated region body
PF: predicated region fallthrough
CT: control target
= control target key end

     0   :  { %s838_s0 = inlined_call_operand.<no memory space> [shape: s32[1], index: 0, kind: input, shape index: {}]   ;;  %s839_s1 = inlined_call_operand.vmem [shape: f32[2,4,256], index: 1, kind: input, shape index: {}]   ;;  %s840_s2 = inlined_call_operand.vmem [shape: f32[8,4], index: 2, kind: input, shape index: {}]   ;;  %s841_s3 = inlined_call_operand.vmem [shape: f32[8,1], index: 3, kind: input, shape index: {}]   ;;  %s842_s4 = inlined_call_operand.hbm [shape: f32[2,8,256], index: 4, kind: output, shape index: {}]  }
   0x1   :  { %9 = sst [smem:[#allocation3]] %s838_s0 }
   0x2   :  { %10 = vsyncpa [#allocation5], 0 }
   0x3   :  { %12 = vsyncpa [#allocation5 + $0x1], 0  ;;  %s719_s17 = smov 0   ;;  %s721_s18 = smov 0  }
   0x4   :  { %s723_s19 = smov 0   ;;  %s725_s20 = smov 0  }
   0x5   :  { %s727_s21 = smov 0   ;;  %s729_s22 = smov 0  }
   0x6 LB: > { %s512_s0 = sadd.s32 4294967295, %s686_s22   ;;  %s513_s23 = sadd.s32 4294967294, %s686_s22   ;;  %s686_s22 = sphi %s729_s22, %s18_s22   ;;  %s682_s21 = sphi %s727_s21, %s849_s21   ;;  %s678_s20 = sphi %s725_s20, %s848_s20   ;;  %s674_s19 = sphi %s723_s19, %s847_s19   ;;  %s670_s18 = sphi %s721_s18, %s846_s18   ;;  %s666_s17 = sphi %s719_s17, %s845_s17  }
   0x7   : > { %s30_s24 = sadd.s32 1, %s682_s21  ;;  %s109_s25 = sadd.s32 1, %s674_s19 }
   0x8   : > { %p32_p0 = scmp.ge.s32.totalorder %s30_s24, 2  ;;  %p119_p1 = scmp.ne.s32.totalorder %s674_s19, %s670_s18 }
   0x9   : > { %p120_p2 = scmp.eq.s32.totalorder %s512_s0, 1  ;;  %p125_p3 = scmp.ne.s32.totalorder %s670_s18, %s666_s17 }
   0xa   : > { %s851_s24 = smov (%p32_p0, %s30_s24), 0  ;;  %p126_p5 = scmp.eq.s32.totalorder %s513_s23, 1 }
   0xb   : > { %p759_p4 = por %p120_p2, %p119_p1  ;;  %s104_s27 = ssub.s32 %s682_s21, %s851_s24 }
   0xc   : > { %p516_p6 = scmp.ge.s32.totalorder %s686_s22, 1  ;;  %p107_p7 = scmp.eq.s32.totalorder %s104_s27, 0 }
   0xd   : > { %p766_p8 = por %p126_p5, %p125_p3  ;;  %p163_p9 = scmp.lt.s32.totalorder %s686_s22, 3 }
   0xe   : > { %s772_s29 = scalar_select %p107_p7, %s674_s19, %s109_s25  }
   0xf   : > { %p164_p10 = pnand %p516_p6, %p163_p9 }
  0x10   : > { %p192_p11 = scmp.lt.s32.totalorder (!%p164_p10), %s678_s20, 1  ;;  %v688_v0 = vmov (!%p164_p10), 0.0   ;;  %v689_v1 = vmov (!%p164_p10), 0   ;;  %v204_v2 = vld [vmem:[%s841_s3] sm:$0xff] (!%p164_p10)  ;;  %vm216_vm0 = vcmask (!%p164_p10), 1043456   ;;  %vm212_vm1 = vcmask (!%p164_p10), 31744  }
  0x11   : > { %167 = sbr.rel (%p164_p10) target bundleno = 264 (0x108), region = 32  ;;  %285 = vmatprep.mubr.f32.mxu0 (!%p164_p10), %v688_v0  ;;  %602 = vset.pattern.permute.xlu0 (!%p164_p10), %v689_v1  ;;  %v203_v5 = vld [vmem:[%s840_s2] sm:$0xff] (!%p164_p10)  ;;  %v293_v6 = vlaneseq (!%p164_p10)  ;;  %s306_s13 = sld [smem:[#allocation3]] (!%p164_p10) }
  0x12   : > { %207 = vperm.xlu0 (!%p164_p10), %602, %v204_v2   ;;  %s523_s14 = sshll.u32 (!%p164_p10), %s678_s20, 11  ;;  %s188_s16 = sand.u32 (!%p164_p10), 1, %s670_s18  }
  0x13   : > { %v296_v7 = vand.u32 (!%p164_p10), 127, %v293_v6  ;;  %v294_v9 = vshrl.u32 (!%p164_p10), %v293_v6, 7  ;;  %v303_v13 = vstv (!%p164_p10), %s523_s14  ;;  %s517_s0 = sshll.u32 (!%p164_p10), %s188_s16, 4  ;;  %s544_s23 = sshll.u32 (!%p164_p10), %s678_s20, 8 }
  0x14   : > { %s190_s25 = scalar_lea.vmem (!%p164_p10), [#allocation4], %s517_s0 }
  0x15   : > { %v297_v8 = vadd.s32 (!%p164_p10), 128, %v296_v7  ;;  %v299_v10 = vmul.u32 (!%p164_p10), 8, %v296_v7  ;;  %s436_s27 = sshll.u32 (!%p164_p10), %s190_s25, 4  ;;  %s793_s27 = int_to_ptr.vmem [resolvable:$true] %s436_s27 }
  0x16   : > { %s608_s8 = scalar_lea.vmem (!%p164_p10), %s793_s27, 256 }
  0x17   : > { %v300_v11 = vmul.u32 (!%p164_p10), 8, %v297_v8  ;;  %v301_v12 = vadd.s32 (!%p164_p10), %v299_v10, %v294_v9  ;;  %s307_s15 = smul.u32 (!%p164_p10), 2654435769, %s306_s13  ;;  %p609_p12 = scmp.ne.s32.totalorder (!%p164_p10), %s793_s27, %s608_s8 }
  0x18   : > { %s193_s6 = scalar_select %p192_p11, %s678_s20, 1 }
  0x19   : > { %v302_v14 = vadd.s32 %v300_v11, %v294_v9  ;;  %v304_v15 = vadd.s32 %v303_v13, %v301_v12  ;;  %v308_v16 = vstv %s307_s15  ;;  %p610_p13 = pnand %p609_p12, %p759_p4  ;;  %s690_s20 = smov [#allocation4]  }
  0x1a   : > { %s543_s7 = sshll.u32 %s193_s6, 3  ;;  %s791_s6 = scalar_lea.hbm %s842_s4, %s544_s23 }
  0x1b   : > { %s199_s10 = scalar_lea.vmem %s839_s1, %s543_s7  ;;  %v305_v17 = vadd.s32 %v303_v13, %v302_v14  ;;  %v309_v18 = vxor.u32 %v308_v16, %v304_v15  ;;  %s420_s7 = scalar_lea.sflag [#allocation5], %s188_s16 }
  0x1c   : > { %v202_v3 = vld [vmem:[%s199_s10] sm:$0xff]  ;;  %p611_p0 = pneg %p610_p13  ;;  %s612_s9 = sshll.u32 %s690_s20, 4  ;;  %s613_s9 = int_to_ptr.vmem [resolvable:$false] %s612_s9 }
  0x1d   : > { %v211_v4 = vcombine.high %v202_v3, %v202_v3  ;;  %v310_v19 = vxor.u32 %v308_v16, %v305_v17  ;;  %v524_v20 = vshrl.u32 %v309_v18, 16  ;;  %s614_s10 = scalar_lea.vmem %s613_s9, 512  ;;  %p615_p1 = scmp.lt.s32.totalorder %s793_s27, %s613_s9 }
  0x1e   : > { %p616_p2 = scmp.lt.s32.totalorder %s614_s10, %s608_s8 }
  0x1f   : > { %520 = vmatprep.subr.msk.mxu0 %vm216_vm0, %v211_v4  ;;  %v525_v21 = vshrl.u32 %v310_v19, 16  ;;  %v315_v22 = vxor.u32 %v524_v20, %v309_v18 }
  0x20   : > { %521 = vmatpush1.msk.msra.mxu0 %vm216_vm0, %v202_v3  ;;  %p617_p3 = por %p616_p2, %p615_p1 }
  0x21   : > { %522 = vmatmul.mubr.msk.f32.vlgmr.msra.gmra.mrb[0].mxu0 %vm212_vm1, %v203_v5  ;;  %v316_v23 = vxor.u32 %v525_v21, %v310_v19  ;;  %v317_v24 = vmul.u32 2246822507, %v315_v22 }
  0x22   : > { %p618_p5 = pnand %p617_p3, %p611_p0 }
  0x23   : > { %v318_v25 = vmul.u32 2246822507, %v316_v23  ;;  %v526_v26 = vshrl.u32 %v317_v24, 13 }
  0x25   : > { %v527_v27 = vshrl.u32 %v318_v25, 13  ;;  %v323_v28 = vxor.u32 %v526_v26, %v317_v24 }
  0x27   : > { %v324_v29 = vxor.u32 %v527_v27, %v318_v25  ;;  %v325_v30 = vmul.u32 3266489909, %v323_v28 }
  0x29   : > { %v326_v31 = vmul.u32 3266489909, %v324_v29  ;;  %v528_v32 = vshrl.u32 %v325_v30, 16 }
  0x2b   : > { %v529_v33 = vshrl.u32 %v326_v31, 16  ;;  %v331_v34 = vxor.u32 %v528_v32, %v325_v30 }
  0x2d   : > { %v332_v35 = vxor.u32 %v529_v33, %v326_v31  ;;  %v333_v36 = vxor.u32 2135587861, %v331_v34 }
  0x2f   : > { %v334_v37 = vxor.u32 2135587861, %v332_v35  ;;  %v530_v38 = vshrl.u32 %v333_v36, 16 }
  0x31   : > { %v531_v39 = vshrl.u32 %v334_v37, 16  ;;  %v339_v40 = vxor.u32 %v530_v38, %v333_v36 }
  0x33   : > { %v340_v41 = vxor.u32 %v531_v39, %v334_v37  ;;  %v341_v42 = vmul.u32 2246822507, %v339_v40 }
  0x35   : > { %v342_v43 = vmul.u32 2246822507, %v340_v41  ;;  %v532_v44 = vshrl.u32 %v341_v42, 13 }
  0x37   : > { %v533_v45 = vshrl.u32 %v342_v43, 13  ;;  %v347_v46 = vxor.u32 %v532_v44, %v341_v42 }
  0x39   : > { %v348_v47 = vxor.u32 %v533_v45, %v342_v43  ;;  %v349_v48 = vmul.u32 3266489909, %v347_v46 }
  0x3b   : > { %v350_v49 = vmul.u32 3266489909, %v348_v47  ;;  %v534_v50 = vshrl.u32 %v349_v48, 16 }
  0x3d   : > { %v535_v51 = vshrl.u32 %v350_v49, 16  ;;  %v355_v52 = vxor.u32 %v534_v50, %v349_v48 }
  0x3f   : > { %v356_v53 = vxor.u32 %v535_v51, %v350_v49  ;;  %v357_v54 = vand.u32 16777215, %v355_v52 }
  0x41   : > { %v358_v55 = vand.u32 16777215, %v356_v53  ;;  %v359_v56 = vcvt.s32.f32 %v357_v54 }
  0x43   : > { %v360_v57 = vcvt.s32.f32 %v358_v55  ;;  %v361_v58 = vmul.f32 5.9604645e-08, %v359_v56 }
  0x45   : > { %v362_v59 = vmul.f32 5.9604645e-08, %v360_v57  ;;  %v363_v60 = vmin.f32 %v361_v58, 0.99651 }
  0x47   : > { %v364_v61 = vmin.f32 %v362_v59, 0.99651  ;;  %v365_v62 = vsub.f32 1.0, %v363_v60  ;;  %v367_v63 = vadd.f32 1.0, %v363_v60 }
  0x49   : > { %v366_v0 = vsub.f32 1.0, %v364_v61  ;;  %v368_v1 = vadd.f32 1.0, %v364_v61  ;;  %v369_v2 = vmul.f32 %v367_v63, %v365_v62 }
  0x4b   : > { %v370_v3 = vmul.f32 %v368_v1, %v366_v0  ;;  %604 = vlog2.f32 %v369_v2 }
  0x4d   : > { %606 = vlog2.f32 %v370_v3 }
  0x55   : > { %v605_v4 = vpop.eup %604 }
  0x56   : > { %v372_v6 = vmul.f32 0.6931472, %v605_v4 }
  0x57   : > { %v607_v5 = vpop.eup %606 }
  0x58   : > { %v374_v7 = vmul.f32 0.6931472, %v607_v5  ;;  %v375_v8 = vsub.f32 0.0, %v372_v6 }
  0x5a   : > { %v376_v9 = vsub.f32 0.0, %v374_v7  ;;  %v536_v10 = vadd.f32 -2.5, %v375_v8 }
  0x5c   : > { %v537_v11 = vadd.f32 -2.5, %v376_v9  ;;  %v379_v12 = vmul.f32 2.8102264e-08, %v536_v10 }
  0x5e   : > { %v380_v13 = vmul.f32 2.8102264e-08, %v537_v11  ;;  %v381_v14 = vadd.f32 3.4327394e-07, %v379_v12 }
  0x60   : > { %v382_v15 = vadd.f32 3.4327394e-07, %v380_v13  ;;  %v383_v16 = vmul.f32 %v536_v10, %v381_v14 }
  0x62   : > { %v384_v17 = vmul.f32 %v537_v11, %v382_v15  ;;  %v385_v18 = vadd.f32 -3.5233877e-06, %v383_v16 }
  0x64   : > { %v386_v19 = vadd.f32 -3.5233877e-06, %v384_v17  ;;  %v387_v20 = vmul.f32 %v536_v10, %v385_v18 }
  0x66   : > { %v388_v21 = vmul.f32 %v537_v11, %v386_v19  ;;  %v389_v22 = vadd.f32 -4.3915065e-06, %v387_v20 }
  0x68   : > { %v390_v23 = vadd.f32 -4.3915065e-06, %v388_v21  ;;  %v391_v24 = vmul.f32 %v536_v10, %v389_v22 }
  0x6a   : > { %v392_v25 = vmul.f32 %v537_v11, %v390_v23  ;;  %v393_v26 = vadd.f32 0.00021858087, %v391_v24 }
  0x6c   : > { %v394_v27 = vadd.f32 0.00021858087, %v392_v25  ;;  %v395_v28 = vmul.f32 %v536_v10, %v393_v26 }
  0x6e   : > { %v396_v29 = vmul.f32 %v537_v11, %v394_v27  ;;  %v397_v30 = vadd.f32 -0.001253725, %v395_v28 }
  0x70   : > { %v398_v31 = vadd.f32 -0.001253725, %v396_v29  ;;  %v399_v32 = vmul.f32 %v536_v10, %v397_v30 }
  0x72   : > { %v400_v33 = vmul.f32 %v537_v11, %v398_v31  ;;  %v401_v34 = vadd.f32 -0.0041776816, %v399_v32 }
  0x74   : > { %v402_v35 = vadd.f32 -0.0041776816, %v400_v33  ;;  %v403_v36 = vmul.f32 %v536_v10, %v401_v34 }
  0x76   : > { %v404_v37 = vmul.f32 %v537_v11, %v402_v35  ;;  %v405_v38 = vadd.f32 0.24664073, %v403_v36 }
  0x78   : > { %v406_v39 = vadd.f32 0.24664073, %v404_v37  ;;  %v407_v40 = vmul.f32 %v536_v10, %v405_v38 }
  0x7a   : > { %v408_v41 = vmul.f32 %v537_v11, %v406_v39  ;;  %v409_v42 = vadd.f32 1.5014094, %v407_v40 }
  0x7c   : > { %v410_v43 = vadd.f32 1.5014094, %v408_v41  ;;  %v411_v44 = vmul.f32 %v409_v42, %v363_v60 }
  0x7e   : > { %v412_v45 = vmul.f32 %v410_v43, %v364_v61  ;;  %v413_v47 = vmul.f32 -0.70710677, %v411_v44 }
  0x80   : > { %v414_v49 = vmul.f32 -0.70710677, %v412_v45 }
  0x91   : > { %v208_v46 = vpop.permute.xlu0 %207 }
  0xf4   : > { %v287_v48 = vpop.f32.mrb[0].mxu0 }
  0xf5   : > { %v288_v50 = vadd.f32 %v287_v48, %v208_v46  ;;  %v289_v51 = vpop.f32.mrb[1].mxu0 }
  0xf6   : > { %v290_v52 = vadd.f32 %v289_v51, %v208_v46 }
  0xf7   : > { %v415_v53 = vadd.f32 %v413_v47, %v288_v50 }
  0xf8   : > { %v416_v54 = vadd.f32 %v414_v49, %v290_v52 }
  0xf9   : > { %417 = vst [vmem:[%s190_s25] sm:$0xff] %v415_v53 }
  0xfa   : > { %418 = vst [vmem:[%s190_s25 + $0x8] sm:$0xff] %v416_v54 }
  0xfb   : > { %621 = shalt.err (!%p618_p5)
}
  0xfc   : > { %s622_s11 = scalar_lea.hbm %s791_s6, 256  ;;  %s626_s14 = scalar_lea.hbm %s842_s4, 512 }
  0xfd   : > { %p623_p6 = scmp.ne.s32.totalorder %s791_s6, %s622_s11  ;;  %p627_p10 = scmp.lt.u32.totalorder %s791_s6, %s842_s4 }
  0xfe   : > { %p628_p11 = scmp.lt.u32.totalorder %s626_s14, %s622_s11  ;;  %p630_p13 = scmp.lt.u32.totalorder %s622_s11, %s791_s6 }
  0xff   : > { %p624_p7 = pnand %p623_p6, %p759_p4 }
 0x100   : > { %p629_p12 = por %p628_p11, %p627_p10 }
 0x101   : > { %p625_p9 = pneg %p624_p7 }
 0x102   : > { %p631_p0 = por %p630_p13, %p629_p12 }
 0x104   : > { %p632_p1 = pnand %p631_p0, %p625_p9 }
 0x106   : > { %635 = shalt.err (!%p632_p1)
}
 0x107   : > { %545 = dma.vmem_to_hbm [thread:$0]  (%p759_p4), %s793_s27, 256, %s791_s6, %s420_s7  }
 0x108 PF: > { %p551_p2 = scmp.ge.s32.totalorder %s686_s22, 2  ;;  %s448_s0 = sand.u32 1, %s666_s17  }
 0x109   : > { %s449_s23 = scalar_lea.sflag [#allocation5], %s448_s0 }
 0x10a   : > { %p548_p3 = pnand %p551_p2, %p766_p8 }
 0x10c   : > { %661 = dma.done.wait (!%p548_p3), %s449_s23, 256  }
 0x10d   : > { %663 = vsyncadd (!%p548_p3), %s449_s23, 4294967040  ;;  %s18_s22 = sadd.s32 1, %s686_s22   ;;  %s845_s17 = smov %s670_s18 }
 0x10e   : > { %p15_p5 = scmp.ge.s32.totalorder %s18_s22, 4   ;;  %s846_s18 = smov %s674_s19 }
 0x10f   : > { %s847_s19 = smov %s772_s29  ;;  %s848_s20 = smov %s682_s21 }
 0x110   : > { %s849_s21 = smov %s851_s24  ;;  %17 = sbr.rel (!%p15_p5) target bundleno = 6 (0x6), region = 67 }
 0x117   :  { %454 = vsyncpa [#allocation5], 1 }
 0x118   :  { %456 = vsyncpa [#allocation5 + $0x1], 1 }

</bundles_post_ra>
